<compile_context>
chip_gen: v6e
topology: v6e:2x2x1
jax: 0.10.0
libtpu: 0.0.40
codegen_flags: <defaults>
</compile_context>

<pallas_src>
import functools

import jax
import jax.numpy as jnp
from jax.experimental import pallas as pl
from jax.experimental.pallas import tpu as pltpu


# ----------------------------------------------------------------------------
# Kernel
# ----------------------------------------------------------------------------
def _attention_kernel(rnn_ref, fhs_ref, wa_ref, ba_ref, wc1t_ref, wc2t_ref,
                      bc_ref, ah_ref, aw_ref, *, bt, b_total, ragged):
    rnn = rnn_ref[...]                                   # (Bt, S, H)
    fhs = fhs_ref[...]                                   # (Bt, H)

    # Fold the attn Linear into a per-batch query vector and scalar:
    #   q_b = fhs_b @ Wa        (H,)
    #   c_b = ba . fhs_b        scalar
    q = jnp.dot(fhs, wa_ref[...], preferred_element_type=jnp.float32)   # (Bt, H)
    c = jnp.sum(fhs * ba_ref[...], axis=-1, keepdims=True)              # (Bt, 1)

    # scores[b, s] = rnn[b, s, :] . q[b, :] + c[b]   (lane reduce, VPU/XLU)
    scores = jnp.sum(rnn * q[:, None, :], axis=-1) + c                  # (Bt, S)

    if ragged:
        # Keep the softmax on ragged-boundary padding rows finite (those rows
        # are dropped at writeback; this just avoids inf/NaN in the exp path).
        rows = (pl.program_id(0) * bt
                + jax.lax.broadcasted_iota(jnp.int32, (bt, 1), 0))
        scores = jnp.where(rows < b_total, scores, 0.0)

    # softmax over the sequence axis (the lane axis here)
    m = jnp.max(scores, axis=-1, keepdims=True)
    e = jnp.exp(scores - m)
    denom = jnp.sum(e, axis=-1, keepdims=True)                          # (Bt, 1)
    # EUP approx reciprocal + one Newton-Raphson step (~f32 accurate, divide
    # stays off the VALU slots).
    r = pl.reciprocal(denom, approx=True)
    r = r * (2.0 - denom * r)
    p = e * r                                                           # (Bt, S)

    # context[b, h] = sum_s p[b, s] * rnn[b, s, h]   (sublane reduce)
    context = jnp.sum(rnn * p[:, :, None], axis=1)                      # (Bt, H)

    # concat_linear on [context | fhs] with pre-transposed weight halves.
    hidden = jnp.tanh(
        jnp.dot(context, wc1t_ref[...], preferred_element_type=jnp.float32)
        + jnp.dot(fhs, wc2t_ref[...], preferred_element_type=jnp.float32)
        + bc_ref[...])                                                  # (Bt, H)

    ah_ref[...] = hidden.astype(ah_ref.dtype)
    aw_ref[...] = p.astype(aw_ref.dtype)


# ----------------------------------------------------------------------------
# Tiling / VMEM helpers
# ----------------------------------------------------------------------------
def _vmem_capacity_bytes():
    try:
        info = pltpu.get_tpu_info()
        cap = getattr(info, "vmem_capacity_bytes", None)
        if cap:
            return int(cap)
    except Exception:
        pass
    return 64 * 1024 * 1024  # conservative (v7x per-TensorCore VMEM)


def _select_batch_tile(B, S, H, itemsize, vmem_limit):
    """Largest VMEM-safe batch tile: multiple of the sublane minimum, <=128,
    and guaranteeing >= 2 grid steps when B > sublane minimum (v7x megacore)."""
    sub = 8 if itemsize >= 4 else (16 if itemsize == 2 else 32)
    if B <= sub:
        return B  # single full-batch block (block dim == full array dim)

    # Per batch row, double-buffered: rnn tile + fhs in, hidden + weights out.
    row_bytes = 2 * (S * H + H + H + S) * itemsize
    # Grid-invariant weights (assume double-buffered as the conservative case).
    weight_bytes = 2 * (3 * H * H + 2 * H) * 4
    budget = int(vmem_limit * 0.7) - weight_bytes

    bt = budget // max(row_bytes, 1)
    # TODO(synk): if bt < sub even at the minimum tile, switch to an S-tiled
    # (online-softmax) variant instead of relying on the scoped-VMEM limit.
    bt = min(bt, -(-B // 2), 128)          # >= 2 grid steps, cap at 128
    bt = max(sub, (bt // sub) * sub)       # sublane-aligned
    return bt


# ----------------------------------------------------------------------------
# Wrapper
# ----------------------------------------------------------------------------
def attention_forward(rnn_outputs, final_hidden_state, w_attn, b_attn, w_cat,
                      b_cat, *, use_pallas=None):
    """rnn_outputs: (B, S, H); final_hidden_state: (B, H, 1).

    Returns (attn_hidden (B,1,H), attn_weights (B,S,1)) — same as PyTorch.
    """
    B, S, H = rnn_outputs.shape
    dtype = rnn_outputs.dtype
    itemsize = jnp.dtype(dtype).itemsize

    if use_pallas is None:
        # Lane-dense gate: below a 128-wide hidden dim every store is a masked
        # partial-lane op and grid overhead dominates — use the fused XLA path.
        use_pallas = (H % 128 == 0) and (H >= 128)
    if not use_pallas:
        return attention_reference(rnn_outputs, final_hidden_state,
                                   w_attn, b_attn, w_cat, b_cat)

    vmem_limit = min(int(_vmem_capacity_bytes() * 0.78), 100 * 1024 * 1024)
    bt = _select_batch_tile(B, S, H, itemsize, vmem_limit)
    grid = (pl.cdiv(B, bt),)
    ragged = (B % bt) != 0

    fhs_rows = jnp.squeeze(final_hidden_state, axis=-1)                 # (B, H)

    # Pre-transpose the concat_linear weight halves once (no in-kernel .T).
    wc1t = jnp.transpose(w_cat[:, :H])                                  # (H, H)
    wc2t = jnp.transpose(w_cat[:, H:])                                  # (H, H)
    ba = b_attn.reshape(1, H).astype(jnp.float32)
    bc = b_cat.reshape(1, H).astype(jnp.float32)

    kernel = functools.partial(_attention_kernel, bt=bt, b_total=B,
                               ragged=ragged)

    def _build_call(single_buffer_weights):
        wkw = {}
        if single_buffer_weights:
            # Grid-invariant weights never change across steps: single-buffer
            # them to reclaim VMEM for larger batch tiles.
            wkw = dict(pipeline_mode=pl.Buffered(1))

        def wspec(shape):
            return pl.BlockSpec(shape, lambda i: (0,) * len(shape), **wkw)

        return pl.pallas_call(
            kernel,
            out_shape=(jax.ShapeDtypeStruct((B, H), dtype),
                       jax.ShapeDtypeStruct((B, S), dtype)),
            grid_spec=pltpu.PrefetchScalarGridSpec(
                num_scalar_prefetch=0,
                grid=grid,
                in_specs=[
                    pl.BlockSpec((bt, S, H), lambda i: (i, 0, 0)),  # rnn_outputs
                    pl.BlockSpec((bt, H), lambda i: (i, 0)),        # fhs rows
                    wspec((H, H)),                                  # W_attn
                    wspec((1, H)),                                  # b_attn
                    wspec((H, H)),                                  # W_cat[:, :H]^T
                    wspec((H, H)),                                  # W_cat[:, H:]^T
                    wspec((1, H)),                                  # b_cat
                ],
                out_specs=[
                    pl.BlockSpec((bt, H), lambda i: (i, 0)),        # attn_hidden rows
                    pl.BlockSpec((bt, S), lambda i: (i, 0)),        # attn_weights (lane-dense)
                ],
            ),
            compiler_params=pltpu.CompilerParams(
                dimension_semantics=("parallel",),
                vmem_limit_bytes=vmem_limit),
        )

    args = (rnn_outputs, fhs_rows, w_attn, ba, wc1t, wc2t, bc)
    try:
        ah_rows, aw_rows = _build_call(True)(*args)
    except Exception:
        # Fallback: default double-buffered weight specs (previously validated).
        ah_rows, aw_rows = _build_call(False)(*args)

    attn_hidden = ah_rows[:, None, :]                                   # (B, 1, H)
    attn_weights = aw_rows[:, :, None]                                  # (B, S, 1)
    return attn_hidden, attn_weights


def attention_reference(rnn_outputs, final_hidden_state, w_attn, b_attn, w_cat,
                        b_cat):
    """Pure-JAX reference mirroring the PyTorch forward exactly."""
    aw = jnp.einsum('bsh,oh->bso', rnn_outputs, w_attn) + b_attn          # (B,S,H)
    aw = jnp.einsum('bsh,bhk->bsk', aw, final_hidden_state)               # (B,S,1)
    aw = jax.nn.softmax(aw, axis=1)
    context = jnp.einsum('bhs,bsk->bhk',
                         jnp.transpose(rnn_outputs, (0, 2, 1)), aw)       # (B,H,1)
    cat = jnp.concatenate([context, final_hidden_state], axis=1)          # (B,2H,1)
    cat_t = jnp.transpose(cat, (0, 2, 1))                                 # (B,1,2H)
    attn_hidden = jnp.tanh(jnp.einsum('bsc,oc->bso', cat_t, w_cat) + b_cat)
    return attn_hidden, aw


if __name__ == "__main__":
    S, H = 8, 32
    key = jax.random.PRNGKey(0)
    k0, k1, k2, k3, k4, k5, k6, k7 = jax.random.split(key, 8)

    # Deterministic parameter init (PyTorch Linear-style uniform bounds).
    bound_attn = 1.0 / jnp.sqrt(H)
    bound_cat = 1.0 / jnp.sqrt(2 * H)
    w_attn = jax.random.uniform(k2, (H, H), jnp.float32, -bound_attn, bound_attn)
    b_attn = jax.random.uniform(k3, (H,), jnp.float32, -bound_attn, bound_attn)
    w_cat = jax.random.uniform(k4, (H, 2 * H), jnp.float32, -bound_cat, bound_cat)
    b_cat = jax.random.uniform(k5, (H,), jnp.float32, -bound_cat, bound_cat)

    # --- Test 1: small batch (single grid step), force the Pallas path -------
    B = 2
    rnn_outputs = jax.random.normal(k0, (B, S, H), dtype=jnp.float32)
    final_hidden_state = jax.random.normal(k1, (B, H, 1), dtype=jnp.float32)

    attn_hidden, attn_weights = attention_forward(
        rnn_outputs, final_hidden_state, w_attn, b_attn, w_cat, b_cat,
        use_pallas=True)
    jax.block_until_ready((attn_hidden, attn_weights))

    ref_hidden, ref_weights = attention_reference(
        rnn_outputs, final_hidden_state, w_attn, b_attn, w_cat, b_cat)

    assert attn_hidden.shape == (B, 1, H)
    assert attn_weights.shape == (B, S, 1)
    assert jnp.allclose(attn_hidden, ref_hidden, atol=2e-5, rtol=2e-5)
    assert jnp.allclose(attn_weights, ref_weights, atol=2e-5, rtol=2e-5)

    # --- Test 2: batch not a multiple of the tile (ragged last block) --------
    B2 = 10
    rnn_outputs2 = jax.random.normal(k6, (B2, S, H), dtype=jnp.float32)
    final_hidden_state2 = jax.random.normal(k7, (B2, H, 1), dtype=jnp.float32)

    ah2, aw2 = attention_forward(
        rnn_outputs2, final_hidden_state2, w_attn, b_attn, w_cat, b_cat,
        use_pallas=True)
    jax.block_until_ready((ah2, aw2))

    ref_h2, ref_w2 = attention_reference(
        rnn_outputs2, final_hidden_state2, w_attn, b_attn, w_cat, b_cat)

    assert ah2.shape == (B2, 1, H)
    assert aw2.shape == (B2, S, 1)
    assert jnp.allclose(ah2, ref_h2, atol=2e-5, rtol=2e-5)
    assert jnp.allclose(aw2, ref_w2, atol=2e-5, rtol=2e-5)

    print("KERNEL_OK")
</pallas_src>

<mosaic_0001>
module attributes {stable_mosaic.version = 11 : i64} {
  func.func @_attention_kernel(%arg0: i32, %arg1: memref<2x8x32xf32, #tpu.memory_space<vmem>>, %arg2: memref<2x32xf32, #tpu.memory_space<vmem>>, %arg3: memref<32x32xf32, #tpu.memory_space<vmem>>, %arg4: memref<1x32xf32, #tpu.memory_space<vmem>>, %arg5: memref<32x32xf32, #tpu.memory_space<vmem>>, %arg6: memref<32x32xf32, #tpu.memory_space<vmem>>, %arg7: memref<1x32xf32, #tpu.memory_space<vmem>>, %arg8: memref<2x32xf32, #tpu.memory_space<vmem>>, %arg9: memref<2x8xf32, #tpu.memory_space<vmem>>) attributes {dimension_semantics = [#tpu.dimension_semantics<parallel>], iteration_bounds = array<i64: 1>, scalar_prefetch = 0 : i64, scratch_operands = 0 : i64, tpu.core_type = #tpu.core_type<tc>, window_params = [{transform_indices = @transform_0, window_bounds = array<i64: 2, 8, 32>}, {transform_indices = @transform_1, window_bounds = array<i64: 2, 32>}, {pipeline_mode = #tpu.pipeline_mode<synchronous>, transform_indices = @transform_2, window_bounds = array<i64: 32, 32>}, {pipeline_mode = #tpu.pipeline_mode<synchronous>, transform_indices = @transform_3, window_bounds = array<i64: 1, 32>}, {pipeline_mode = #tpu.pipeline_mode<synchronous>, transform_indices = @transform_4, window_bounds = array<i64: 32, 32>}, {pipeline_mode = #tpu.pipeline_mode<synchronous>, transform_indices = @transform_5, window_bounds = array<i64: 32, 32>}, {pipeline_mode = #tpu.pipeline_mode<synchronous>, transform_indices = @transform_6, window_bounds = array<i64: 1, 32>}, {transform_indices = @transform_7, window_bounds = array<i64: 2, 32>}, {transform_indices = @transform_8, window_bounds = array<i64: 2, 8>}]} {
    %c0 = arith.constant 0 : index
    %c0_0 = arith.constant 0 : index
    %c0_1 = arith.constant 0 : index
    %0 = vector.load %arg1[%c0, %c0_0, %c0_1] : memref<2x8x32xf32, #tpu.memory_space<vmem>>, vector<2x8x32xf32>
    %c0_2 = arith.constant 0 : index
    %c0_3 = arith.constant 0 : index
    %1 = vector.load %arg2[%c0_2, %c0_3] : memref<2x32xf32, #tpu.memory_space<vmem>>, vector<2x32xf32>
    %c0_4 = arith.constant 0 : index
    %c0_5 = arith.constant 0 : index
    %2 = vector.load %arg3[%c0_4, %c0_5] : memref<32x32xf32, #tpu.memory_space<vmem>>, vector<32x32xf32>
    %cst = arith.constant dense<0.000000e+00> : vector<2x32xf32>
    %3 = tpu.matmul %1, %2, %cst {dimension_numbers = #tpu.dot_dimension_numbers<[1], [0], [0], [1], [0, 0, 1, 1], [], []>} : vector<2x32xf32>, vector<32x32xf32>, vector<2x32xf32> -> vector<2x32xf32>
    %c0_6 = arith.constant 0 : index
    %c0_7 = arith.constant 0 : index
    %4 = vector.load %arg4[%c0_6, %c0_7] : memref<1x32xf32, #tpu.memory_space<vmem>>, vector<1x32xf32>
    %5 = vector.broadcast %4 : vector<1x32xf32> to vector<2x32xf32>
    %6 = arith.mulf %1, %5 : vector<2x32xf32>
    %cst_8 = arith.constant dense<0.000000e+00> : vector<2xf32>
    %7 = vector.multi_reduction <add>, %6, %cst_8 [1] : vector<2x32xf32> to vector<2xf32>
    %8 = vector.shape_cast %7 : vector<2xf32> to vector<2x1xf32>
    %9 = vector.shape_cast %3 : vector<2x32xf32> to vector<2x1x32xf32>
    %10 = vector.broadcast %9 : vector<2x1x32xf32> to vector<2x8x32xf32>
    %11 = arith.mulf %0, %10 : vector<2x8x32xf32>
    %cst_9 = arith.constant dense<0.000000e+00> : vector<2x8xf32>
    %12 = vector.multi_reduction <add>, %11, %cst_9 [2] : vector<2x8x32xf32> to vector<2x8xf32>
    %13 = vector.broadcast %8 : vector<2x1xf32> to vector<2x8xf32>
    %14 = arith.addf %12, %13 : vector<2x8xf32>
    %cst_10 = arith.constant dense<0xFF800000> : vector<2xf32>
    %15 = vector.multi_reduction <maximumf>, %14, %cst_10 [1] : vector<2x8xf32> to vector<2xf32>
    %16 = vector.shape_cast %15 : vector<2xf32> to vector<2x1xf32>
    %17 = vector.broadcast %16 : vector<2x1xf32> to vector<2x8xf32>
    %18 = arith.subf %14, %17 : vector<2x8xf32>
    %19 = math.exp %18 : vector<2x8xf32>
    %cst_11 = arith.constant dense<0.000000e+00> : vector<2xf32>
    %20 = vector.multi_reduction <add>, %19, %cst_11 [1] : vector<2x8xf32> to vector<2xf32>
    %21 = vector.shape_cast %20 : vector<2xf32> to vector<2x1xf32>
    %22 = tpu.reciprocal %21 {approx = true} : vector<2x1xf32> -> vector<2x1xf32>
    %23 = arith.mulf %21, %22 : vector<2x1xf32>
    %cst_12 = arith.constant 2.000000e+00 : f32
    %24 = vector.broadcast %cst_12 : f32 to vector<2x1xf32>
    %25 = arith.subf %24, %23 : vector<2x1xf32>
    %26 = arith.mulf %22, %25 : vector<2x1xf32>
    %27 = vector.broadcast %26 : vector<2x1xf32> to vector<2x8xf32>
    %28 = arith.mulf %19, %27 : vector<2x8xf32>
    %29 = vector.shape_cast %28 : vector<2x8xf32> to vector<2x8x1xf32>
    %30 = vector.broadcast %29 : vector<2x8x1xf32> to vector<2x8x32xf32>
    %31 = arith.mulf %0, %30 : vector<2x8x32xf32>
    %cst_13 = arith.constant dense<0.000000e+00> : vector<2x32xf32>
    %32 = vector.multi_reduction <add>, %31, %cst_13 [1] : vector<2x8x32xf32> to vector<2x32xf32>
    %c0_14 = arith.constant 0 : index
    %c0_15 = arith.constant 0 : index
    %33 = vector.load %arg5[%c0_14, %c0_15] : memref<32x32xf32, #tpu.memory_space<vmem>>, vector<32x32xf32>
    %cst_16 = arith.constant dense<0.000000e+00> : vector<2x32xf32>
    %34 = tpu.matmul %32, %33, %cst_16 {dimension_numbers = #tpu.dot_dimension_numbers<[1], [0], [0], [1], [0, 0, 1, 1], [], []>} : vector<2x32xf32>, vector<32x32xf32>, vector<2x32xf32> -> vector<2x32xf32>
    %c0_17 = arith.constant 0 : index
    %c0_18 = arith.constant 0 : index
    %35 = vector.load %arg6[%c0_17, %c0_18] : memref<32x32xf32, #tpu.memory_space<vmem>>, vector<32x32xf32>
    %cst_19 = arith.constant dense<0.000000e+00> : vector<2x32xf32>
    %36 = tpu.matmul %1, %35, %cst_19 {dimension_numbers = #tpu.dot_dimension_numbers<[1], [0], [0], [1], [0, 0, 1, 1], [], []>} : vector<2x32xf32>, vector<32x32xf32>, vector<2x32xf32> -> vector<2x32xf32>
    %37 = arith.addf %34, %36 : vector<2x32xf32>
    %c0_20 = arith.constant 0 : index
    %c0_21 = arith.constant 0 : index
    %38 = vector.load %arg7[%c0_20, %c0_21] : memref<1x32xf32, #tpu.memory_space<vmem>>, vector<1x32xf32>
    %39 = vector.broadcast %38 : vector<1x32xf32> to vector<2x32xf32>
    %40 = arith.addf %37, %39 : vector<2x32xf32>
    %41 = math.tanh %40 : vector<2x32xf32>
    %c0_22 = arith.constant 0 : index
    %c0_23 = arith.constant 0 : index
    %42 = vector.load %arg8[%c0_22, %c0_23] : memref<2x32xf32, #tpu.memory_space<vmem>>, vector<2x32xf32>
    tpu.vector_store %arg8[%c0_22, %c0_23], %41 {strides = array<i32>} : memref<2x32xf32, #tpu.memory_space<vmem>>, vector<2x32xf32>,
    %c0_24 = arith.constant 0 : index
    %c0_25 = arith.constant 0 : index
    %43 = vector.load %arg9[%c0_24, %c0_25] : memref<2x8xf32, #tpu.memory_space<vmem>>, vector<2x8xf32>
    tpu.vector_store %arg9[%c0_24, %c0_25], %28 {strides = array<i32>} : memref<2x8xf32, #tpu.memory_space<vmem>>, vector<2x8xf32>,
    return
  }
  func.func @transform_0(%arg0: i32) -> (i32, i32, i32) {
    %c0_i32 = arith.constant 0 : i32
    %c0_i32_0 = arith.constant 0 : i32
    %c0_i32_1 = arith.constant 0 : i32
    return %arg0, %c0_i32, %c0_i32_0 : i32, i32, i32
  }
  func.func @transform_1(%arg0: i32) -> (i32, i32) {
    %c0_i32 = arith.constant 0 : i32
    %c0_i32_0 = arith.constant 0 : i32
    return %arg0, %c0_i32 : i32, i32
  }
  func.func @transform_2(%arg0: i32) -> (i32, i32) {
    %c0_i32 = arith.constant 0 : i32
    %c0_i32_0 = arith.constant 0 : i32
    %c0_i32_1 = arith.constant 0 : i32
    return %c0_i32, %c0_i32_0 : i32, i32
  }
  func.func @transform_3(%arg0: i32) -> (i32, i32) {
    %c0_i32 = arith.constant 0 : i32
    %c0_i32_0 = arith.constant 0 : i32
    %c0_i32_1 = arith.constant 0 : i32
    return %c0_i32, %c0_i32_0 : i32, i32
  }
  func.func @transform_4(%arg0: i32) -> (i32, i32) {
    %c0_i32 = arith.constant 0 : i32
    %c0_i32_0 = arith.constant 0 : i32
    %c0_i32_1 = arith.constant 0 : i32
    return %c0_i32, %c0_i32_0 : i32, i32
  }
  func.func @transform_5(%arg0: i32) -> (i32, i32) {
    %c0_i32 = arith.constant 0 : i32
    %c0_i32_0 = arith.constant 0 : i32
    %c0_i32_1 = arith.constant 0 : i32
    return %c0_i32, %c0_i32_0 : i32, i32
  }
  func.func @transform_6(%arg0: i32) -> (i32, i32) {
    %c0_i32 = arith.constant 0 : i32
    %c0_i32_0 = arith.constant 0 : i32
    %c0_i32_1 = arith.constant 0 : i32
    return %c0_i32, %c0_i32_0 : i32, i32
  }
  func.func @transform_7(%arg0: i32) -> (i32, i32) {
    %c0_i32 = arith.constant 0 : i32
    %c0_i32_0 = arith.constant 0 : i32
    return %arg0, %c0_i32 : i32, i32
  }
  func.func @transform_8(%arg0: i32) -> (i32, i32) {
    %c0_i32 = arith.constant 0 : i32
    %c0_i32_0 = arith.constant 0 : i32
    return %arg0, %c0_i32 : i32, i32
  }
}

module attributes {stable_mosaic.version = 11 : i64} {
  func.func @_attention_kernel(%arg0: i32, %arg1: memref<2x8x32xf32, #tpu.memory_space<vmem>>, %arg2: memref<2x32xf32, #tpu.memory_space<vmem>>, %arg3: memref<32x32xf32, #tpu.memory_space<vmem>>, %arg4: memref<1x32xf32, #tpu.memory_space<vmem>>, %arg5: memref<32x32xf32, #tpu.memory_space<vmem>>, %arg6: memref<32x32xf32, #tpu.memory_space<vmem>>, %arg7: memref<1x32xf32, #tpu.memory_space<vmem>>, %arg8: memref<2x32xf32, #tpu.memory_space<vmem>>, %arg9: memref<2x8xf32, #tpu.memory_space<vmem>>) attributes {dimension_semantics = [#tpu.dimension_semantics<parallel>], iteration_bounds = array<i64: 1>, scalar_prefetch = 0 : i64, scratch_operands = 0 : i64, tpu.core_type = #tpu.core_type<tc>, window_params = [{transform_indices = @transform_0, window_bounds = array<i64: 2, 8, 32>}, {transform_indices = @transform_1, window_bounds = array<i64: 2, 32>}, {pipeline_mode = #tpu.pipeline_mode<synchronous>, transform_indices = @transform_2, window_bounds = array<i64: 32, 32>}, {pipeline_mode = #tpu.pipeline_mode<synchronous>, transform_indices = @transform_3, window_bounds = array<i64: 1, 32>}, {pipeline_mode = #tpu.pipeline_mode<synchronous>, transform_indices = @transform_4, window_bounds = array<i64: 32, 32>}, {pipeline_mode = #tpu.pipeline_mode<synchronous>, transform_indices = @transform_5, window_bounds = array<i64: 32, 32>}, {pipeline_mode = #tpu.pipeline_mode<synchronous>, transform_indices = @transform_6, window_bounds = array<i64: 1, 32>}, {transform_indices = @transform_7, window_bounds = array<i64: 2, 32>}, {transform_indices = @transform_8, window_bounds = array<i64: 2, 8>}]} {
    %c0 = arith.constant 0 : index
    %c0_0 = arith.constant 0 : index
    %c0_1 = arith.constant 0 : index
    %0 = vector.load %arg1[%c0, %c0_0, %c0_1] : memref<2x8x32xf32, #tpu.memory_space<vmem>>, vector<2x8x32xf32>
    %c0_2 = arith.constant 0 : index
    %c0_3 = arith.constant 0 : index
    %1 = vector.load %arg2[%c0_2, %c0_3] : memref<2x32xf32, #tpu.memory_space<vmem>>, vector<2x32xf32>
    %c0_4 = arith.constant 0 : index
    %c0_5 = arith.constant 0 : index
    %2 = vector.load %arg3[%c0_4, %c0_5] : memref<32x32xf32, #tpu.memory_space<vmem>>, vector<32x32xf32>
    %cst = arith.constant dense<0.000000e+00> : vector<2x32xf32>
    %3 = tpu.matmul %1, %2, %cst {dimension_numbers = #tpu.dot_dimension_numbers<[1], [0], [0], [1], [0, 0, 1, 1], [], []>} : vector<2x32xf32>, vector<32x32xf32>, vector<2x32xf32> -> vector<2x32xf32>
    %c0_6 = arith.constant 0 : index
    %c0_7 = arith.constant 0 : index
    %4 = vector.load %arg4[%c0_6, %c0_7] : memref<1x32xf32, #tpu.memory_space<vmem>>, vector<1x32xf32>
    %5 = vector.broadcast %4 : vector<1x32xf32> to vector<2x32xf32>
    %6 = arith.mulf %1, %5 : vector<2x32xf32>
    %cst_8 = arith.constant dense<0.000000e+00> : vector<2xf32>
    %7 = vector.multi_reduction <add>, %6, %cst_8 [1] : vector<2x32xf32> to vector<2xf32>
    %8 = vector.shape_cast %7 : vector<2xf32> to vector<2x1xf32>
    %9 = vector.shape_cast %3 : vector<2x32xf32> to vector<2x1x32xf32>
    %10 = vector.broadcast %9 : vector<2x1x32xf32> to vector<2x8x32xf32>
    %11 = arith.mulf %0, %10 : vector<2x8x32xf32>
    %cst_9 = arith.constant dense<0.000000e+00> : vector<2x8xf32>
    %12 = vector.multi_reduction <add>, %11, %cst_9 [2] : vector<2x8x32xf32> to vector<2x8xf32>
    %13 = vector.broadcast %8 : vector<2x1xf32> to vector<2x8xf32>
    %14 = arith.addf %12, %13 : vector<2x8xf32>
    %cst_10 = arith.constant dense<0xFF800000> : vector<2xf32>
    %15 = vector.multi_reduction <maximumf>, %14, %cst_10 [1] : vector<2x8xf32> to vector<2xf32>
    %16 = vector.shape_cast %15 : vector<2xf32> to vector<2x1xf32>
    %17 = vector.broadcast %16 : vector<2x1xf32> to vector<2x8xf32>
    %18 = arith.subf %14, %17 : vector<2x8xf32>
    %19 = math.exp %18 : vector<2x8xf32>
    %cst_11 = arith.constant dense<0.000000e+00> : vector<2xf32>
    %20 = vector.multi_reduction <add>, %19, %cst_11 [1] : vector<2x8xf32> to vector<2xf32>
    %21 = vector.shape_cast %20 : vector<2xf32> to vector<2x1xf32>
    %22 = tpu.reciprocal %21 {approx = true} : vector<2x1xf32> -> vector<2x1xf32>
    %23 = arith.mulf %21, %22 : vector<2x1xf32>
    %cst_12 = arith.constant 2.000000e+00 : f32
    %24 = vector.broadcast %cst_12 : f32 to vector<2x1xf32>
    %25 = arith.subf %24, %23 : vector<2x1xf32>
    %26 = arith.mulf %22, %25 : vector<2x1xf32>
    %27 = vector.broadcast %26 : vector<2x1xf32> to vector<2x8xf32>
    %28 = arith.mulf %19, %27 : vector<2x8xf32>
    %29 = vector.shape_cast %28 : vector<2x8xf32> to vector<2x8x1xf32>
    %30 = vector.broadcast %29 : vector<2x8x1xf32> to vector<2x8x32xf32>
    %31 = arith.mulf %0, %30 : vector<2x8x32xf32>
    %cst_13 = arith.constant dense<0.000000e+00> : vector<2x32xf32>
    %32 = vector.multi_reduction <add>, %31, %cst_13 [1] : vector<2x8x32xf32> to vector<2x32xf32>
    %c0_14 = arith.constant 0 : index
    %c0_15 = arith.constant 0 : index
    %33 = vector.load %arg5[%c0_14, %c0_15] : memref<32x32xf32, #tpu.memory_space<vmem>>, vector<32x32xf32>
    %cst_16 = arith.constant dense<0.000000e+00> : vector<2x32xf32>
    %34 = tpu.matmul %32, %33, %cst_16 {dimension_numbers = #tpu.dot_dimension_numbers<[1], [0], [0], [1], [0, 0, 1, 1], [], []>} : vector<2x32xf32>, vector<32x32xf32>, vector<2x32xf32> -> vector<2x32xf32>
    %c0_17 = arith.constant 0 : index
    %c0_18 = arith.constant 0 : index
    %35 = vector.load %arg6[%c0_17, %c0_18] : memref<32x32xf32, #tpu.memory_space<vmem>>, vector<32x32xf32>
    %cst_19 = arith.constant dense<0.000000e+00> : vector<2x32xf32>
    %36 = tpu.matmul %1, %35, %cst_19 {dimension_numbers = #tpu.dot_dimension_numbers<[1], [0], [0], [1], [0, 0, 1, 1], [], []>} : vector<2x32xf32>, vector<32x32xf32>, vector<2x32xf32> -> vector<2x32xf32>
    %37 = arith.addf %34, %36 : vector<2x32xf32>
    %c0_20 = arith.constant 0 : index
    %c0_21 = arith.constant 0 : index
    %38 = vector.load %arg7[%c0_20, %c0_21] : memref<1x32xf32, #tpu.memory_space<vmem>>, vector<1x32xf32>
    %39 = vector.broadcast %38 : vector<1x32xf32> to vector<2x32xf32>
    %40 = arith.addf %37, %39 : vector<2x32xf32>
    %41 = math.tanh %40 : vector<2x32xf32>
    %c0_22 = arith.constant 0 : index
    %c0_23 = arith.constant 0 : index
    %42 = vector.load %arg8[%c0_22, %c0_23] : memref<2x32xf32, #tpu.memory_space<vmem>>, vector<2x32xf32>
    tpu.vector_store %arg8[%c0_22, %c0_23], %41 {strides = array<i32>} : memref<2x32xf32, #tpu.memory_space<vmem>>, vector<2x32xf32>,
    %c0_24 = arith.constant 0 : index
    %c0_25 = arith.constant 0 : index
    %43 = vector.load %arg9[%c0_24, %c0_25] : memref<2x8xf32, #tpu.memory_space<vmem>>, vector<2x8xf32>
    tpu.vector_store %arg9[%c0_24, %c0_25], %28 {strides = array<i32>} : memref<2x8xf32, #tpu.memory_space<vmem>>, vector<2x8xf32>,
    return
  }
  func.func @transform_0(%arg0: i32) -> (i32, i32, i32) {
    %c0_i32 = arith.constant 0 : i32
    %c0_i32_0 = arith.constant 0 : i32
    %c0_i32_1 = arith.constant 0 : i32
    return %arg0, %c0_i32, %c0_i32_0 : i32, i32, i32
  }
  func.func @transform_1(%arg0: i32) -> (i32, i32) {
    %c0_i32 = arith.constant 0 : i32
    %c0_i32_0 = arith.constant 0 : i32
    return %arg0, %c0_i32 : i32, i32
  }
  func.func @transform_2(%arg0: i32) -> (i32, i32) {
    %c0_i32 = arith.constant 0 : i32
    %c0_i32_0 = arith.constant 0 : i32
    %c0_i32_1 = arith.constant 0 : i32
    return %c0_i32, %c0_i32_0 : i32, i32
  }
  func.func @transform_3(%arg0: i32) -> (i32, i32) {
    %c0_i32 = arith.constant 0 : i32
    %c0_i32_0 = arith.constant 0 : i32
    %c0_i32_1 = arith.constant 0 : i32
    return %c0_i32, %c0_i32_0 : i32, i32
  }
  func.func @transform_4(%arg0: i32) -> (i32, i32) {
    %c0_i32 = arith.constant 0 : i32
    %c0_i32_0 = arith.constant 0 : i32
    %c0_i32_1 = arith.constant 0 : i32
    return %c0_i32, %c0_i32_0 : i32, i32
  }
  func.func @transform_5(%arg0: i32) -> (i32, i32) {
    %c0_i32 = arith.constant 0 : i32
    %c0_i32_0 = arith.constant 0 : i32
    %c0_i32_1 = arith.constant 0 : i32
    return %c0_i32, %c0_i32_0 : i32, i32
  }
  func.func @transform_6(%arg0: i32) -> (i32, i32) {
    %c0_i32 = arith.constant 0 : i32
    %c0_i32_0 = arith.constant 0 : i32
    %c0_i32_1 = arith.constant 0 : i32
    return %c0_i32, %c0_i32_0 : i32, i32
  }
  func.func @transform_7(%arg0: i32) -> (i32, i32) {
    %c0_i32 = arith.constant 0 : i32
    %c0_i32_0 = arith.constant 0 : i32
    return %arg0, %c0_i32 : i32, i32
  }
  func.func @transform_8(%arg0: i32) -> (i32, i32) {
    %c0_i32 = arith.constant 0 : i32
    %c0_i32_0 = arith.constant 0 : i32
    return %arg0, %c0_i32 : i32, i32
  }
}

</mosaic_0001>

<bundles_post_ra>
// kernel: tpu_custom_call.1
= control target key start
LH: loop header
LB: loop body
LE: loop exit
PB: predicated region body
PF: predicated region fallthrough
CT: control target
= control target key end

     0   :  { %14 = vsyncpa [#allocation3], 0  ;;  %s939_s0 = inlined_call_operand.hbm [shape: f32[2,8,32], index: 0, kind: input, shape index: {}]   ;;  %s940_s1 = inlined_call_operand.hbm [shape: f32[2,32], index: 1, kind: input, shape index: {}]   ;;  %s941_s2 = inlined_call_operand.hbm [shape: f32[32,32], index: 2, kind: input, shape index: {}]   ;;  %s942_s3 = inlined_call_operand.vmem [shape: f32[1,32], index: 3, kind: input, shape index: {}]   ;;  %s943_s4 = inlined_call_operand.hbm [shape: f32[32,32], index: 4, kind: input, shape index: {}]   ;;  %s944_s5 = inlined_call_operand.hbm [shape: f32[32,32], index: 5, kind: input, shape index: {}]   ;;  %s945_s6 = inlined_call_operand.vmem [shape: f32[1,32], index: 6, kind: input, shape index: {}]   ;;  %s946_s7 = inlined_call_operand.hbm [shape: f32[2,32], index: 7, kind: output, shape index: {0}]   ;;  %s947_s8 = inlined_call_operand.hbm [shape: f32[2,8], index: 8, kind: output, shape index: {1}]  }
   0x1   :  { %15 = vsyncpa [#allocation6], 0 }
   0x2   :  { %16 = vsyncpa [#allocation9], 0 }
   0x3   :  { %17 = vsyncpa [#allocation4], 0 }
   0x4   :  { %18 = vsyncpa [#allocation13], 0  ;;  %s780_s27 = smov [#allocation5]  }
   0x5   :  { %s37_s28 = sshll.u32 %s780_s27, 4  ;;  %s38_s28 = int_to_ptr.vmem [resolvable:$true] %s37_s28 }
   0x6   :  { %s638_s29 = scalar_lea.vmem %s38_s28, 32  ;;  %p643_p1 = scmp.lt.s32.totalorder %s38_s28, %s38_s28 }
   0x7   :  { %p639_p0 = scmp.ne.s32.totalorder %s38_s28, %s638_s29  ;;  %p644_p2 = scmp.lt.s32.totalorder %s638_s29, %s638_s29 }
   0x9   :  { %p645_p3 = por %p644_p2, %p643_p1 }
   0xb   :  { %p646_p4 = pnand %p645_p3, %p639_p0 }
   0xd   :  { %649 = shalt.err (!%p646_p4)
}
   0xe   :  { %40 = dma.hbm_to_vmem [thread:$0]  %s940_s1, 32, %s38_s28, [#allocation6]  }
   0xf   :  { %s781_s10 = smov [#allocation8]   ;;  %s782_s12 = smov [#allocation2]  }
  0x10   :  { %s60_s11 = sshll.u32 %s781_s10, 4  ;;  %s24_s13 = sshll.u32 %s782_s12, 4  ;;  %s61_s11 = int_to_ptr.vmem [resolvable:$true] %s60_s11  ;;  %s25_s13 = int_to_ptr.vmem [resolvable:$true] %s24_s13 }
  0x11   :  { %s658_s14 = scalar_lea.vmem %s61_s11, 512  ;;  %p663_p6 = scmp.lt.s32.totalorder %s61_s11, %s61_s11 }
  0x12   :  { %p659_p5 = scmp.ne.s32.totalorder %s61_s11, %s658_s14  ;;  %p664_p7 = scmp.lt.s32.totalorder %s658_s14, %s658_s14 }
  0x14   :  { %p665_p8 = por %p664_p7, %p663_p6 }
  0x16   :  { %p666_p9 = pnand %p665_p8, %p659_p5 }
  0x18   :  { %669 = shalt.err (!%p666_p9)
}
  0x19   :  { %s783_s15 = smov 128   ;;  %s784_s16 = smov 8  }
  0x1a   :  { %66 = dma.hbm_to_vmem [thread:$0]  %s943_s4, 512, %s61_s11, [#allocation9], %s783_s15, %s783_s15, %s784_s16  }
  0x1b   :  { %s678_s1 = scalar_lea.vmem %s25_s13, 256  ;;  %p683_p11 = scmp.lt.s32.totalorder %s25_s13, %s25_s13 }
  0x1c   :  { %p679_p10 = scmp.ne.s32.totalorder %s25_s13, %s678_s1  ;;  %p684_p12 = scmp.lt.s32.totalorder %s678_s1, %s678_s1 }
  0x1e   :  { %p685_p13 = por %p684_p12, %p683_p11 }
  0x20   :  { %p686_p0 = pnand %p685_p13, %p679_p10 }
  0x22   :  { %689 = shalt.err (!%p686_p0)
}
  0x23   :  { %30 = dma.hbm_to_vmem [thread:$0]  %s939_s0, 256, %s25_s13, [#allocation3], %s783_s15, %s783_s15, %s784_s16  }
  0x24   :  { %s785_s21 = smov [#allocation7]   ;;  %s786_s23 = smov [#allocation10]  }
  0x25   :  { %s46_s22 = sshll.u32 %s785_s21, 4  ;;  %s72_s4 = sshll.u32 %s786_s23, 4  ;;  %s47_s22 = int_to_ptr.vmem [resolvable:$true] %s46_s22  ;;  %s73_s4 = int_to_ptr.vmem [resolvable:$true] %s72_s4 }
  0x26   :  { %s698_s24 = scalar_lea.vmem %s47_s22, 512  ;;  %p703_p2 = scmp.lt.s32.totalorder %s47_s22, %s47_s22 }
  0x27   :  { %p699_p1 = scmp.ne.s32.totalorder %s47_s22, %s698_s24  ;;  %p704_p3 = scmp.lt.s32.totalorder %s698_s24, %s698_s24 }
  0x29   :  { %p705_p4 = por %p704_p3, %p703_p2 }
  0x2b   :  { %p706_p5 = pnand %p705_p4, %p699_p1 }
  0x2d   :  { %709 = shalt.err (!%p706_p5)
}
  0x2e   :  { %52 = dma.hbm_to_vmem [thread:$0]  %s941_s2, 512, %s47_s22, [#allocation6], %s783_s15, %s783_s15, %s784_s16  }
  0x2f   :  { %s718_s0 = scalar_lea.vmem %s73_s4, 512  ;;  %p723_p7 = scmp.lt.s32.totalorder %s73_s4, %s73_s4 }
  0x30   :  { %p719_p6 = scmp.ne.s32.totalorder %s73_s4, %s718_s0  ;;  %p724_p8 = scmp.lt.s32.totalorder %s718_s0, %s718_s0 }
  0x32   :  { %p725_p9 = por %p724_p8, %p723_p7 }
  0x34   :  { %p726_p10 = pnand %p725_p9, %p719_p6 }
  0x36   :  { %729 = shalt.err (!%p726_p10)
}
  0x37   :  { %78 = dma.hbm_to_vmem [thread:$0]  %s944_s5, 512, %s73_s4, [#allocation9], %s783_s15, %s783_s15, %s784_s16  }
  0x38   :  { %770 = dma.done.wait [#allocation3], 256  }
  0x39   :  { %771 = vsyncadd [#allocation3], 4294967040 }
  0x3a   :  { %772 = dma.done.wait [#allocation6], 544  }
  0x3b   :  { %773 = vsyncadd [#allocation6], 4294966752 }
  0x3c   :  { %774 = dma.done.wait [#allocation9], 1024  }
  0x3d   :  { %775 = vsyncadd [#allocation9], 4294966272  ;;  %v787_v0 = vmov 0.0   ;;  %vm788_vm0 = vmmov 0   ;;  %v102_v1 = vld [vmem:[#allocation7 + $0x18] sm:$0xff]  ;;  %v101_v2 = vld [vmem:[#allocation7 + $0x10] sm:$0xff]  ;;  %v193_v11 = vlaneseq }
  0x3e   :  { %574 = vmatprep.subr.mxu0 %v787_v0  ;;  %582 = vmatprep.mubr.msk.f32.mxu0 %vm788_vm0, %v787_v0  ;;  %v100_v3 = vld [vmem:[#allocation7 + $0x8] sm:$0xff]  ;;  %v99_v4 = vld [vmem:[#allocation7] sm:$0xff]  ;;  %v873_v5 = vld [vmem:[#allocation5] sm:$0x3]  ;;  %vm103_vm1 = vcmask 261120   ;;  %vm185_vm2 = vcmask 254976  }
  0x3f   :  { %585 = vmatprep.subr.mxu1 %v787_v0  ;;  %593 = vmatprep.mubr.msk.f32.mxu1 %vm788_vm0, %v787_v0  ;;  %v555_v6 = vld [vmem:[%s942_s3] ss:$0 sm:$0xff]  ;;  %v789_v9 = vmov 1966171168   ;;  %v194_v13 = vshrl.u32 %v193_v11, 7  ;;  %v891_v24 = vld [vmem:[#allocation2 + $0x8] sm:$0xff] }
  0x40   :  { %575 = vmatpush3.msra.mxu0 %v102_v1  ;;  %v184_v7 = vmul.f32 %v555_v6, %v873_v5  ;;  %v191_v10 = vunpack.c.l.s4 %v789_v9  ;;  %v888_v21 = vld [vmem:[#allocation2] sm:$0xff]  ;;  %v790_v30 = vmov 0   ;;  %v252_v39 = vand.u32 127, %v193_v11  ;;  %v356_v9 = vld [vmem:[#allocation10 + $0x18] sm:$0xff]  ;;  %s791_s3 = smov [#allocation12]  }
  0x41   :  { %576 = vmatprep.subr.mxu0 %v787_v0  ;;  %v886_v17 = vsub.s32 0, %v194_v13  ;;  %620 = vset.pattern.permute.xlu1 %v790_v30  ;;  %v237_v32 = vsub.s32 1, %v194_v13  ;;  %vm261_vm3 = vcmask 1041409   ;;  %vm264_vm4 = vcmask 58368   ;;  %v352_v11 = vld [vmem:[#allocation8 + $0x18] sm:$0xff]  ;;  %s539_s29 = sshll.u32 %s791_s3, 4  ;;  %s540_s29 = int_to_ptr.vmem [resolvable:$true] %s539_s29 }
  0x42   :  { %577 = vmatpush3.msra.mxu0 %v101_v2  ;;  %v186_v8 = vsel %vm185_vm2, %v184_v7, 0.0  ;;  %v192_v12 = vunpack.c.0.s8 %v191_v10  ;;  %621 = vset.pattern.permute.xlu0 %v790_v30  ;;  %v899_v40 = vsub.s32 %v252_v39, %v194_v13  ;;  %v355_v10 = vld [vmem:[#allocation10 + $0x10] sm:$0xff]  ;;  %s730_s30 = scalar_lea.vmem %s540_s29, 32  ;;  %p735_p12 = scmp.lt.s32.totalorder %s540_s29, %s540_s29 }
  0x43   :  { %578 = vmatprep.subr.mxu0 %v787_v0  ;;  %187 = vadd.xlane.f32.xlu0 %v186_v8  ;;  %p731_p11 = scmp.ne.s32.totalorder %s540_s29, %s730_s30  ;;  %p736_p13 = scmp.lt.s32.totalorder %s730_s30, %s730_s30 }
  0x44   :  { %579 = vmatpush3.msra.mxu0 %v100_v3  ;;  %v195_v14 = vsub.s32 %v192_v12, %v194_v13  ;;  %586 = vmatpush3.msra.mxu1 %v356_v9  ;;  %v354_v12 = vld [vmem:[#allocation10 + $0x8] sm:$0xff]  ;;  %v351_v13 = vld [vmem:[#allocation8 + $0x10] sm:$0xff] }
  0x45   :  { %580 = vmatprep.subr.mxu0 %v787_v0  ;;  %587 = vmatprep.subr.mxu1 %v787_v0  ;;  %p737_p0 = por %p736_p13, %p735_p12 }
  0x46   :  { %581 = vmatpush3.msra.mxu0 %v99_v4  ;;  %588 = vmatpush3.msra.mxu1 %v355_v10 }
  0x47   :  { %583 = vmatmul.mubr.msk.f32.vlgmr.msra.gmra.mxu0 %vm103_vm1, %v873_v5  ;;  %596 = vmatprep.subr.mxu0 %v787_v0  ;;  %p738_p1 = pnand %p737_p0, %p731_p11 }
  0x48   :  { %604 = vmatprep.mubr.msk.f32.mxu0 %vm788_vm0, %v787_v0  ;;  %597 = vmatpush3.msra.mxu0 %v352_v11 }
  0x49   :  { %589 = vmatprep.subr.mxu1 %v787_v0  ;;  %598 = vmatprep.subr.mxu0 %v787_v0 }
  0x4a   :  { %590 = vmatpush3.msra.mxu1 %v354_v12  ;;  %599 = vmatpush3.msra.mxu0 %v351_v13 }
  0x4b   :  { %591 = vmatprep.subr.mxu1 %v787_v0  ;;  %600 = vmatprep.subr.mxu0 %v787_v0 }
  0xcc   :  { %v188_v31 = vpop.xlane.xlu0 %187 }
  0xcd   :  { %v234_v33 = vrot.slane %v188_v31, %v886_v17  ;;  %v238_v35 = vrot.slane %v188_v31, %v237_v32 }
 0x107   :  { %v173_v15 = vpop.f32.mrf.mxu0 }
 0x108   :  { %v196_v16 = vrot.slane %v173_v15, %v195_v14  ;;  %v350_v15 = vld [vmem:[#allocation8 + $0x8] sm:$0xff] }
 0x109   :  { %v584_v18 = vpop.f32.mrf.mxu0  ;;  %601 = vmatpush3.msra.mxu0 %v350_v15 }
 0x10a   :  { %v197_v19 = vcombine.high %v196_v16, %v196_v16  ;;  %v204_v20 = vrot.slane %v196_v16, %v195_v14  ;;  %v349_v16 = vld [vmem:[#allocation8] sm:$0xff]  ;;  %602 = vmatprep.subr.mxu0 %v787_v0 }
 0x10b   :  { %603 = vmatpush3.msra.mxu0 %v349_v16 }
 0x10c   :  { %v211_v22 = vrot.slane %v197_v19, %v195_v14  ;;  %v215_v23 = vrot.slane %v204_v20, %v886_v17  ;;  %v353_v14 = vld [vmem:[#allocation10] sm:$0xff] }
 0x10d   :  { %592 = vmatpush3.msra.mxu1 %v353_v14 }
 0x10e   :  { %v222_v25 = vmul.f32 %v215_v23, %v888_v21  ;;  %v219_v26 = vrot.slane %v211_v22, %v886_v17  ;;  %594 = vmatmul.mubr.msk.f32.vlgmr.msra.gmra.mxu1 %vm103_vm1, %v873_v5 }
 0x110   :  { %v224_v27 = vsel %vm103_vm1, %v222_v25, 0.0  ;;  %v223_v28 = vmul.f32 %v219_v26, %v891_v24 }
 0x111   :  { %225 = vadd.xlane.f32.xlu0 %v224_v27 }
 0x112   :  { %v227_v29 = vsel %vm103_vm1, %v223_v28, 0.0 }
 0x113   :  { %228 = vadd.xlane.f32.xlu1 %v227_v29 }
 0x19a   :  { %v226_v34 = vpop.xlane.xlu0 %225 }
 0x19b   :  { %v241_v36 = vadd.f32 %v234_v33, %v226_v34 }
 0x19c   :  { %v229_v37 = vpop.xlane.xlu1 %228 }
 0x19d   :  { %v242_v38 = vadd.f32 %v238_v35, %v229_v37  ;;  %246 = vperm.xlu1 %620, %v241_v36  }
 0x19f   :  { %249 = vperm.xlu0 %621, %v242_v38  }
 0x1ce   :  { %v423_v37 = vpop.f32.mrf.mxu1 }
 0x218   :  { %v247_v41 = vpop.permute.xlu1 %246 }
 0x219   :  { %v256_v43 = vrot.slane %v247_v41, %v899_v40 }
 0x21a   :  { %v250_v42 = vpop.permute.xlu0 %249 }
 0x21b   :  { %v260_v44 = vrot.slane %v250_v42, %v899_v40 }
 0x21d   :  { %v262_v45 = vsel %vm261_vm3, %v260_v44, %v256_v43 }
 0x21e   :  { %v265_v46 = vsel %vm264_vm4, %v262_v45, -inf }
 0x21f   :  { %266 = vmax.xlane.f32.xlu1 %v265_v46 }
 0x2a8   :  { %v267_v47 = vpop.xlane.xlu1 %266 }
 0x2a9   :  { %v272_v48 = vrot.slane %v267_v47, %v886_v17  ;;  %v276_v49 = vrot.slane %v267_v47, %v237_v32 }
 0x2ab   :  { %v279_v50 = vsub.f32 %v241_v36, %v272_v48  ;;  %v280_v51 = vsub.f32 %v242_v38, %v276_v49  ;;  %v595_v38 = vpop.f32.mrf.mxu1 }
 0x2ad   :  { %v281_v52 = vmul.f32 1.442695, %v279_v50  ;;  %v283_v53 = vmul.f32 1.442695, %v280_v51 }
 0x2af   :  { %622 = vpow2.f32 %v281_v52 }
 0x2b0   :  { %624 = vpow2.f32 %v283_v53 }
 0x2bc   :  { %v623_v54 = vpop.eup %622 }
 0x2bd   :  { %288 = vperm.xlu0 %621, %v623_v54   ;;  %v625_v55 = vpop.eup %624 }
 0x2c1   :  { %291 = vperm.xlu0 %621, %v625_v55  }
 0x338   :  { %v289_v56 = vpop.permute.xlu0 %288 }
 0x339   :  { %v296_v58 = vrot.slane %v289_v56, %v899_v40 }
 0x33c   :  { %v292_v57 = vpop.permute.xlu0 %291 }
 0x33d   :  { %v300_v59 = vrot.slane %v292_v57, %v899_v40 }
 0x33f   :  { %v301_v60 = vsel %vm261_vm3, %v300_v59, %v296_v58 }
 0x340   :  { %v303_v61 = vsel %vm264_vm4, %v301_v60, 0.0 }
 0x341   :  { %304 = vadd.xlane.f32.xlu1 %v303_v61 }
 0x3ca   :  { %v305_v62 = vpop.xlane.xlu1 %304 }
 0x3cb   :  { %626 = vrcp.f32 %v305_v62 }
 0x3d8   :  { %v627_v63 = vpop.eup %626 }
 0x3d9   :  { %v307_v1 = vmul.f32 %v627_v63, %v305_v62 }
 0x3db   :  { %v308_v2 = vsub.f32 2.0, %v307_v1 }
 0x3dd   :  { %v309_v3 = vmul.f32 %v627_v63, %v308_v2 }
 0x3df   :  { %v318_v4 = vrot.slane %v309_v3, %v237_v32  ;;  %v314_v6 = vrot.slane %v309_v3, %v886_v17 }
 0x3e1   :  { %v322_v7 = vmul.f32 %v625_v55, %v318_v4  ;;  %v321_v8 = vmul.f32 %v623_v54, %v314_v6 }
 0x3e3   :  { %330 = vperm.xlu1 %620, %v322_v7   ;;  %325 = vperm.xlu0 %621, %v321_v8  }
 0x45e   :  { %v331_v17 = vpop.permute.xlu1 %330  ;;  %v326_v18 = vpop.permute.xlu0 %325 }
 0x45f   :  { %v334_v19 = vmul.f32 %v331_v17, %v891_v24  ;;  %v519_v20 = vrot.slane %v331_v17, %v899_v40  ;;  %v333_v22 = vmul.f32 %v326_v18, %v888_v21  ;;  %v515_v23 = vrot.slane %v326_v18, %v899_v40 }
 0x461   :  { %v342_v25 = vsel %vm103_vm1, %v334_v19, 0.0  ;;  %v335_v26 = vsel %vm103_vm1, %v333_v22, 0.0  ;;  %v520_v27 = vsel %vm261_vm3, %v519_v20, %v515_v23 }
 0x462   :  { %v343_v5 = vrot.slane %v342_v25, 4  ;;  %v336_v28 = vrot.slane %v335_v26, 4  ;;  %522 = vst.msk [vmem:[#allocation12] sm:$0x3] %vm264_vm4, %v520_v27 }
 0x464   :  { %v344_v0 = vadd.f32 %v343_v5, %v342_v25  ;;  %v337_v29 = vadd.f32 %v336_v28, %v335_v26 }
 0x466   :  { %v345_v30 = vrot.slane %v344_v0, 2  ;;  %v338_v24 = vrot.slane %v337_v29, 2 }
 0x468   :  { %v346_v31 = vadd.f32 %v345_v30, %v344_v0  ;;  %v339_v32 = vadd.f32 %v338_v24, %v337_v29 }
 0x46a   :  { %v347_v33 = vrot.slane %v346_v31, 1  ;;  %v340_v21 = vrot.slane %v339_v32, 1 }
 0x46c   :  { %v348_v34 = vadd.f32 %v347_v33, %v346_v31  ;;  %v341_v35 = vadd.f32 %v340_v21, %v339_v32 }
 0x46e   :  { %v429_v36 = vsel %vm261_vm3, %v348_v34, %v341_v35 }
 0x46f   :  { %605 = vmatmul.mubr.msk.f32.vlgmr.msra.gmra.mxu0 %vm103_vm1, %v429_v36 }
 0x470   :  { %741 = shalt.err (!%p738_p1)
}
 0x471   :  { %542 = dma.vmem_to_hbm [thread:$0]  %s540_s29, 32, %s947_s8, [#allocation13]   ;;  %v558_v40 = vld [vmem:[%s945_s6] ss:$0 sm:$0xff] }
 0x472   :  { %s792_s13 = smov [#allocation11]  }
 0x473   :  { %s529_s14 = sshll.u32 %s792_s13, 4  ;;  %s530_s14 = int_to_ptr.vmem [resolvable:$true] %s529_s14 }
 0x474   :  { %s750_s15 = scalar_lea.vmem %s530_s14, 32  ;;  %p755_p3 = scmp.lt.s32.totalorder %s530_s14, %s530_s14 }
 0x475   :  { %p751_p2 = scmp.ne.s32.totalorder %s530_s14, %s750_s15  ;;  %p756_p4 = scmp.lt.s32.totalorder %s750_s15, %s750_s15 }
 0x477   :  { %p757_p5 = por %p756_p4, %p755_p3 }
 0x479   :  { %p758_p6 = pnand %p757_p5, %p751_p2 }
 0x52f   :  { %v498_v39 = vpop.f32.mrf.mxu0 }
 0x530   :  { %v499_v41 = vadd.f32 %v498_v39, %v423_v37 }
 0x531   :  { %v606_v42 = vpop.f32.mrf.mxu0 }
 0x532   :  { %v509_v43 = vadd.f32 %v558_v40, %v499_v41 }
 0x534   :  { %628 = vtanh.f32 %v509_v43 }
 0x541   :  { %v629_v44 = vpop.eup %628 }
 0x542   :  { %511 = vst.msk [vmem:[#allocation11] sm:$0x3] %vm185_vm2, %v629_v44 }
 0x543   :  { %761 = shalt.err (!%p758_p6)
}
 0x544   :  { %532 = dma.vmem_to_hbm [thread:$0]  %s530_s14, 32, %s946_s7, [#allocation4]  }
 0x545   :  { %776 = dma.done.wait [#allocation4], 32  }
 0x546   :  { %777 = vsyncadd [#allocation4], 4294967264 }
 0x547   :  { %778 = dma.done.wait [#allocation13], 32  }
 0x548   :  { %779 = vsyncadd [#allocation13], 4294967264 }
 0x549   :  { %549 = vsyncpa [#allocation3], 1 }
 0x54a   :  { %550 = vsyncpa [#allocation6], 1 }
 0x54b   :  { %551 = vsyncpa [#allocation9], 1 }
 0x54c   :  { %552 = vsyncpa [#allocation4], 1 }
 0x54d   :  { %553 = vsyncpa [#allocation13], 1 }

// kernel: tpu_custom_call.1
= control target key start
LH: loop header
LB: loop body
LE: loop exit
PB: predicated region body
PF: predicated region fallthrough
CT: control target
= control target key end

     0   :  { %14 = vsyncpa [#allocation3], 0  ;;  %s939_s0 = inlined_call_operand.hbm [shape: f32[2,8,32], index: 0, kind: input, shape index: {}]   ;;  %s940_s1 = inlined_call_operand.hbm [shape: f32[2,32], index: 1, kind: input, shape index: {}]   ;;  %s941_s2 = inlined_call_operand.hbm [shape: f32[32,32], index: 2, kind: input, shape index: {}]   ;;  %s942_s3 = inlined_call_operand.vmem [shape: f32[1,32], index: 3, kind: input, shape index: {}]   ;;  %s943_s4 = inlined_call_operand.hbm [shape: f32[32,32], index: 4, kind: input, shape index: {}]   ;;  %s944_s5 = inlined_call_operand.hbm [shape: f32[32,32], index: 5, kind: input, shape index: {}]   ;;  %s945_s6 = inlined_call_operand.vmem [shape: f32[1,32], index: 6, kind: input, shape index: {}]   ;;  %s946_s7 = inlined_call_operand.hbm [shape: f32[2,32], index: 7, kind: output, shape index: {0}]   ;;  %s947_s8 = inlined_call_operand.hbm [shape: f32[2,8], index: 8, kind: output, shape index: {1}]  }
   0x1   :  { %15 = vsyncpa [#allocation6], 0 }
   0x2   :  { %16 = vsyncpa [#allocation9], 0 }
   0x3   :  { %17 = vsyncpa [#allocation4], 0 }
   0x4   :  { %18 = vsyncpa [#allocation13], 0  ;;  %s780_s27 = smov [#allocation5]  }
   0x5   :  { %s37_s28 = sshll.u32 %s780_s27, 4  ;;  %s38_s28 = int_to_ptr.vmem [resolvable:$true] %s37_s28 }
   0x6   :  { %s638_s29 = scalar_lea.vmem %s38_s28, 32  ;;  %p643_p1 = scmp.lt.s32.totalorder %s38_s28, %s38_s28 }
   0x7   :  { %p639_p0 = scmp.ne.s32.totalorder %s38_s28, %s638_s29  ;;  %p644_p2 = scmp.lt.s32.totalorder %s638_s29, %s638_s29 }
   0x9   :  { %p645_p3 = por %p644_p2, %p643_p1 }
   0xb   :  { %p646_p4 = pnand %p645_p3, %p639_p0 }
   0xd   :  { %649 = shalt.err (!%p646_p4)
}
   0xe   :  { %40 = dma.hbm_to_vmem [thread:$0]  %s940_s1, 32, %s38_s28, [#allocation6]  }
   0xf   :  { %s781_s10 = smov [#allocation8]   ;;  %s782_s12 = smov [#allocation2]  }
  0x10   :  { %s60_s11 = sshll.u32 %s781_s10, 4  ;;  %s24_s13 = sshll.u32 %s782_s12, 4  ;;  %s61_s11 = int_to_ptr.vmem [resolvable:$true] %s60_s11  ;;  %s25_s13 = int_to_ptr.vmem [resolvable:$true] %s24_s13 }
  0x11   :  { %s658_s14 = scalar_lea.vmem %s61_s11, 512  ;;  %p663_p6 = scmp.lt.s32.totalorder %s61_s11, %s61_s11 }
  0x12   :  { %p659_p5 = scmp.ne.s32.totalorder %s61_s11, %s658_s14  ;;  %p664_p7 = scmp.lt.s32.totalorder %s658_s14, %s658_s14 }
  0x14   :  { %p665_p8 = por %p664_p7, %p663_p6 }
  0x16   :  { %p666_p9 = pnand %p665_p8, %p659_p5 }
  0x18   :  { %669 = shalt.err (!%p666_p9)
}
  0x19   :  { %s783_s15 = smov 128   ;;  %s784_s16 = smov 8  }
  0x1a   :  { %66 = dma.hbm_to_vmem [thread:$0]  %s943_s4, 512, %s61_s11, [#allocation9], %s783_s15, %s783_s15, %s784_s16  }
  0x1b   :  { %s678_s1 = scalar_lea.vmem %s25_s13, 256  ;;  %p683_p11 = scmp.lt.s32.totalorder %s25_s13, %s25_s13 }
  0x1c   :  { %p679_p10 = scmp.ne.s32.totalorder %s25_s13, %s678_s1  ;;  %p684_p12 = scmp.lt.s32.totalorder %s678_s1, %s678_s1 }
  0x1e   :  { %p685_p13 = por %p684_p12, %p683_p11 }
  0x20   :  { %p686_p0 = pnand %p685_p13, %p679_p10 }
  0x22   :  { %689 = shalt.err (!%p686_p0)
}
  0x23   :  { %30 = dma.hbm_to_vmem [thread:$0]  %s939_s0, 256, %s25_s13, [#allocation3], %s783_s15, %s783_s15, %s784_s16  }
  0x24   :  { %s785_s21 = smov [#allocation7]   ;;  %s786_s23 = smov [#allocation10]  }
  0x25   :  { %s46_s22 = sshll.u32 %s785_s21, 4  ;;  %s72_s4 = sshll.u32 %s786_s23, 4  ;;  %s47_s22 = int_to_ptr.vmem [resolvable:$true] %s46_s22  ;;  %s73_s4 = int_to_ptr.vmem [resolvable:$true] %s72_s4 }
  0x26   :  { %s698_s24 = scalar_lea.vmem %s47_s22, 512  ;;  %p703_p2 = scmp.lt.s32.totalorder %s47_s22, %s47_s22 }
  0x27   :  { %p699_p1 = scmp.ne.s32.totalorder %s47_s22, %s698_s24  ;;  %p704_p3 = scmp.lt.s32.totalorder %s698_s24, %s698_s24 }
  0x29   :  { %p705_p4 = por %p704_p3, %p703_p2 }
  0x2b   :  { %p706_p5 = pnand %p705_p4, %p699_p1 }
  0x2d   :  { %709 = shalt.err (!%p706_p5)
}
  0x2e   :  { %52 = dma.hbm_to_vmem [thread:$0]  %s941_s2, 512, %s47_s22, [#allocation6], %s783_s15, %s783_s15, %s784_s16  }
  0x2f   :  { %s718_s0 = scalar_lea.vmem %s73_s4, 512  ;;  %p723_p7 = scmp.lt.s32.totalorder %s73_s4, %s73_s4 }
  0x30   :  { %p719_p6 = scmp.ne.s32.totalorder %s73_s4, %s718_s0  ;;  %p724_p8 = scmp.lt.s32.totalorder %s718_s0, %s718_s0 }
  0x32   :  { %p725_p9 = por %p724_p8, %p723_p7 }
  0x34   :  { %p726_p10 = pnand %p725_p9, %p719_p6 }
  0x36   :  { %729 = shalt.err (!%p726_p10)
}
  0x37   :  { %78 = dma.hbm_to_vmem [thread:$0]  %s944_s5, 512, %s73_s4, [#allocation9], %s783_s15, %s783_s15, %s784_s16  }
  0x38   :  { %770 = dma.done.wait [#allocation3], 256  }
  0x39   :  { %771 = vsyncadd [#allocation3], 4294967040 }
  0x3a   :  { %772 = dma.done.wait [#allocation6], 544  }
  0x3b   :  { %773 = vsyncadd [#allocation6], 4294966752 }
  0x3c   :  { %774 = dma.done.wait [#allocation9], 1024  }
  0x3d   :  { %775 = vsyncadd [#allocation9], 4294966272  ;;  %v787_v0 = vmov 0.0   ;;  %vm788_vm0 = vmmov 0   ;;  %v102_v1 = vld [vmem:[#allocation7 + $0x18] sm:$0xff]  ;;  %v101_v2 = vld [vmem:[#allocation7 + $0x10] sm:$0xff]  ;;  %v193_v11 = vlaneseq }
  0x3e   :  { %574 = vmatprep.subr.mxu0 %v787_v0  ;;  %582 = vmatprep.mubr.msk.f32.mxu0 %vm788_vm0, %v787_v0  ;;  %v100_v3 = vld [vmem:[#allocation7 + $0x8] sm:$0xff]  ;;  %v99_v4 = vld [vmem:[#allocation7] sm:$0xff]  ;;  %v873_v5 = vld [vmem:[#allocation5] sm:$0x3]  ;;  %vm103_vm1 = vcmask 261120   ;;  %vm185_vm2 = vcmask 254976  }
  0x3f   :  { %585 = vmatprep.subr.mxu1 %v787_v0  ;;  %593 = vmatprep.mubr.msk.f32.mxu1 %vm788_vm0, %v787_v0  ;;  %v555_v6 = vld [vmem:[%s942_s3] ss:$0 sm:$0xff]  ;;  %v789_v9 = vmov 1966171168   ;;  %v194_v13 = vshrl.u32 %v193_v11, 7  ;;  %v891_v24 = vld [vmem:[#allocation2 + $0x8] sm:$0xff] }
  0x40   :  { %575 = vmatpush3.msra.mxu0 %v102_v1  ;;  %v184_v7 = vmul.f32 %v555_v6, %v873_v5  ;;  %v191_v10 = vunpack.c.l.s4 %v789_v9  ;;  %v888_v21 = vld [vmem:[#allocation2] sm:$0xff]  ;;  %v790_v30 = vmov 0   ;;  %v252_v39 = vand.u32 127, %v193_v11  ;;  %v356_v9 = vld [vmem:[#allocation10 + $0x18] sm:$0xff]  ;;  %s791_s3 = smov [#allocation12]  }
  0x41   :  { %576 = vmatprep.subr.mxu0 %v787_v0  ;;  %v886_v17 = vsub.s32 0, %v194_v13  ;;  %620 = vset.pattern.permute.xlu1 %v790_v30  ;;  %v237_v32 = vsub.s32 1, %v194_v13  ;;  %vm261_vm3 = vcmask 1041409   ;;  %vm264_vm4 = vcmask 58368   ;;  %v352_v11 = vld [vmem:[#allocation8 + $0x18] sm:$0xff]  ;;  %s539_s29 = sshll.u32 %s791_s3, 4  ;;  %s540_s29 = int_to_ptr.vmem [resolvable:$true] %s539_s29 }
  0x42   :  { %577 = vmatpush3.msra.mxu0 %v101_v2  ;;  %v186_v8 = vsel %vm185_vm2, %v184_v7, 0.0  ;;  %v192_v12 = vunpack.c.0.s8 %v191_v10  ;;  %621 = vset.pattern.permute.xlu0 %v790_v30  ;;  %v899_v40 = vsub.s32 %v252_v39, %v194_v13  ;;  %v355_v10 = vld [vmem:[#allocation10 + $0x10] sm:$0xff]  ;;  %s730_s30 = scalar_lea.vmem %s540_s29, 32  ;;  %p735_p12 = scmp.lt.s32.totalorder %s540_s29, %s540_s29 }
  0x43   :  { %578 = vmatprep.subr.mxu0 %v787_v0  ;;  %187 = vadd.xlane.f32.xlu0 %v186_v8  ;;  %p731_p11 = scmp.ne.s32.totalorder %s540_s29, %s730_s30  ;;  %p736_p13 = scmp.lt.s32.totalorder %s730_s30, %s730_s30 }
  0x44   :  { %579 = vmatpush3.msra.mxu0 %v100_v3  ;;  %v195_v14 = vsub.s32 %v192_v12, %v194_v13  ;;  %586 = vmatpush3.msra.mxu1 %v356_v9  ;;  %v354_v12 = vld [vmem:[#allocation10 + $0x8] sm:$0xff]  ;;  %v351_v13 = vld [vmem:[#allocation8 + $0x10] sm:$0xff] }
  0x45   :  { %580 = vmatprep.subr.mxu0 %v787_v0  ;;  %587 = vmatprep.subr.mxu1 %v787_v0  ;;  %p737_p0 = por %p736_p13, %p735_p12 }
  0x46   :  { %581 = vmatpush3.msra.mxu0 %v99_v4  ;;  %588 = vmatpush3.msra.mxu1 %v355_v10 }
  0x47   :  { %583 = vmatmul.mubr.msk.f32.vlgmr.msra.gmra.mxu0 %vm103_vm1, %v873_v5  ;;  %596 = vmatprep.subr.mxu0 %v787_v0  ;;  %p738_p1 = pnand %p737_p0, %p731_p11 }
  0x48   :  { %604 = vmatprep.mubr.msk.f32.mxu0 %vm788_vm0, %v787_v0  ;;  %597 = vmatpush3.msra.mxu0 %v352_v11 }
  0x49   :  { %589 = vmatprep.subr.mxu1 %v787_v0  ;;  %598 = vmatprep.subr.mxu0 %v787_v0 }
  0x4a   :  { %590 = vmatpush3.msra.mxu1 %v354_v12  ;;  %599 = vmatpush3.msra.mxu0 %v351_v13 }
  0x4b   :  { %591 = vmatprep.subr.mxu1 %v787_v0  ;;  %600 = vmatprep.subr.mxu0 %v787_v0 }
  0xcc   :  { %v188_v31 = vpop.xlane.xlu0 %187 }
  0xcd   :  { %v234_v33 = vrot.slane %v188_v31, %v886_v17  ;;  %v238_v35 = vrot.slane %v188_v31, %v237_v32 }
 0x107   :  { %v173_v15 = vpop.f32.mrf.mxu0 }
 0x108   :  { %v196_v16 = vrot.slane %v173_v15, %v195_v14  ;;  %v350_v15 = vld [vmem:[#allocation8 + $0x8] sm:$0xff] }
 0x109   :  { %v584_v18 = vpop.f32.mrf.mxu0  ;;  %601 = vmatpush3.msra.mxu0 %v350_v15 }
 0x10a   :  { %v197_v19 = vcombine.high %v196_v16, %v196_v16  ;;  %v204_v20 = vrot.slane %v196_v16, %v195_v14  ;;  %v349_v16 = vld [vmem:[#allocation8] sm:$0xff]  ;;  %602 = vmatprep.subr.mxu0 %v787_v0 }
 0x10b   :  { %603 = vmatpush3.msra.mxu0 %v349_v16 }
 0x10c   :  { %v211_v22 = vrot.slane %v197_v19, %v195_v14  ;;  %v215_v23 = vrot.slane %v204_v20, %v886_v17  ;;  %v353_v14 = vld [vmem:[#allocation10] sm:$0xff] }
 0x10d   :  { %592 = vmatpush3.msra.mxu1 %v353_v14 }
 0x10e   :  { %v222_v25 = vmul.f32 %v215_v23, %v888_v21  ;;  %v219_v26 = vrot.slane %v211_v22, %v886_v17  ;;  %594 = vmatmul.mubr.msk.f32.vlgmr.msra.gmra.mxu1 %vm103_vm1, %v873_v5 }
 0x110   :  { %v224_v27 = vsel %vm103_vm1, %v222_v25, 0.0  ;;  %v223_v28 = vmul.f32 %v219_v26, %v891_v24 }
 0x111   :  { %225 = vadd.xlane.f32.xlu0 %v224_v27 }
 0x112   :  { %v227_v29 = vsel %vm103_vm1, %v223_v28, 0.0 }
 0x113   :  { %228 = vadd.xlane.f32.xlu1 %v227_v29 }
 0x19a   :  { %v226_v34 = vpop.xlane.xlu0 %225 }
 0x19b   :  { %v241_v36 = vadd.f32 %v234_v33, %v226_v34 }
 0x19c   :  { %v229_v37 = vpop.xlane.xlu1 %228 }
 0x19d   :  { %v242_v38 = vadd.f32 %v238_v35, %v229_v37  ;;  %246 = vperm.xlu1 %620, %v241_v36  }
 0x19f   :  { %249 = vperm.xlu0 %621, %v242_v38  }
 0x1ce   :  { %v423_v37 = vpop.f32.mrf.mxu1 }
 0x218   :  { %v247_v41 = vpop.permute.xlu1 %246 }
 0x219   :  { %v256_v43 = vrot.slane %v247_v41, %v899_v40 }
 0x21a   :  { %v250_v42 = vpop.permute.xlu0 %249 }
 0x21b   :  { %v260_v44 = vrot.slane %v250_v42, %v899_v40 }
 0x21d   :  { %v262_v45 = vsel %vm261_vm3, %v260_v44, %v256_v43 }
 0x21e   :  { %v265_v46 = vsel %vm264_vm4, %v262_v45, -inf }
 0x21f   :  { %266 = vmax.xlane.f32.xlu1 %v265_v46 }
 0x2a8   :  { %v267_v47 = vpop.xlane.xlu1 %266 }
 0x2a9   :  { %v272_v48 = vrot.slane %v267_v47, %v886_v17  ;;  %v276_v49 = vrot.slane %v267_v47, %v237_v32 }
 0x2ab   :  { %v279_v50 = vsub.f32 %v241_v36, %v272_v48  ;;  %v280_v51 = vsub.f32 %v242_v38, %v276_v49  ;;  %v595_v38 = vpop.f32.mrf.mxu1 }
 0x2ad   :  { %v281_v52 = vmul.f32 1.442695, %v279_v50  ;;  %v283_v53 = vmul.f32 1.442695, %v280_v51 }
 0x2af   :  { %622 = vpow2.f32 %v281_v52 }
 0x2b0   :  { %624 = vpow2.f32 %v283_v53 }
 0x2bc   :  { %v623_v54 = vpop.eup %622 }
 0x2bd   :  { %288 = vperm.xlu0 %621, %v623_v54   ;;  %v625_v55 = vpop.eup %624 }
 0x2c1   :  { %291 = vperm.xlu0 %621, %v625_v55  }
 0x338   :  { %v289_v56 = vpop.permute.xlu0 %288 }
 0x339   :  { %v296_v58 = vrot.slane %v289_v56, %v899_v40 }
 0x33c   :  { %v292_v57 = vpop.permute.xlu0 %291 }
 0x33d   :  { %v300_v59 = vrot.slane %v292_v57, %v899_v40 }
 0x33f   :  { %v301_v60 = vsel %vm261_vm3, %v300_v59, %v296_v58 }
 0x340   :  { %v303_v61 = vsel %vm264_vm4, %v301_v60, 0.0 }
 0x341   :  { %304 = vadd.xlane.f32.xlu1 %v303_v61 }
 0x3ca   :  { %v305_v62 = vpop.xlane.xlu1 %304 }
 0x3cb   :  { %626 = vrcp.f32 %v305_v62 }
 0x3d8   :  { %v627_v63 = vpop.eup %626 }
 0x3d9   :  { %v307_v1 = vmul.f32 %v627_v63, %v305_v62 }
 0x3db   :  { %v308_v2 = vsub.f32 2.0, %v307_v1 }
 0x3dd   :  { %v309_v3 = vmul.f32 %v627_v63, %v308_v2 }
 0x3df   :  { %v318_v4 = vrot.slane %v309_v3, %v237_v32  ;;  %v314_v6 = vrot.slane %v309_v3, %v886_v17 }
 0x3e1   :  { %v322_v7 = vmul.f32 %v625_v55, %v318_v4  ;;  %v321_v8 = vmul.f32 %v623_v54, %v314_v6 }
 0x3e3   :  { %330 = vperm.xlu1 %620, %v322_v7   ;;  %325 = vperm.xlu0 %621, %v321_v8  }
 0x45e   :  { %v331_v17 = vpop.permute.xlu1 %330  ;;  %v326_v18 = vpop.permute.xlu0 %325 }
 0x45f   :  { %v334_v19 = vmul.f32 %v331_v17, %v891_v24  ;;  %v519_v20 = vrot.slane %v331_v17, %v899_v40  ;;  %v333_v22 = vmul.f32 %v326_v18, %v888_v21  ;;  %v515_v23 = vrot.slane %v326_v18, %v899_v40 }
 0x461   :  { %v342_v25 = vsel %vm103_vm1, %v334_v19, 0.0  ;;  %v335_v26 = vsel %vm103_vm1, %v333_v22, 0.0  ;;  %v520_v27 = vsel %vm261_vm3, %v519_v20, %v515_v23 }
 0x462   :  { %v343_v5 = vrot.slane %v342_v25, 4  ;;  %v336_v28 = vrot.slane %v335_v26, 4  ;;  %522 = vst.msk [vmem:[#allocation12] sm:$0x3] %vm264_vm4, %v520_v27 }
 0x464   :  { %v344_v0 = vadd.f32 %v343_v5, %v342_v25  ;;  %v337_v29 = vadd.f32 %v336_v28, %v335_v26 }
 0x466   :  { %v345_v30 = vrot.slane %v344_v0, 2  ;;  %v338_v24 = vrot.slane %v337_v29, 2 }
 0x468   :  { %v346_v31 = vadd.f32 %v345_v30, %v344_v0  ;;  %v339_v32 = vadd.f32 %v338_v24, %v337_v29 }
 0x46a   :  { %v347_v33 = vrot.slane %v346_v31, 1  ;;  %v340_v21 = vrot.slane %v339_v32, 1 }
 0x46c   :  { %v348_v34 = vadd.f32 %v347_v33, %v346_v31  ;;  %v341_v35 = vadd.f32 %v340_v21, %v339_v32 }
 0x46e   :  { %v429_v36 = vsel %vm261_vm3, %v348_v34, %v341_v35 }
 0x46f   :  { %605 = vmatmul.mubr.msk.f32.vlgmr.msra.gmra.mxu0 %vm103_vm1, %v429_v36 }
 0x470   :  { %741 = shalt.err (!%p738_p1)
}
 0x471   :  { %542 = dma.vmem_to_hbm [thread:$0]  %s540_s29, 32, %s947_s8, [#allocation13]   ;;  %v558_v40 = vld [vmem:[%s945_s6] ss:$0 sm:$0xff] }
 0x472   :  { %s792_s13 = smov [#allocation11]  }
 0x473   :  { %s529_s14 = sshll.u32 %s792_s13, 4  ;;  %s530_s14 = int_to_ptr.vmem [resolvable:$true] %s529_s14 }
 0x474   :  { %s750_s15 = scalar_lea.vmem %s530_s14, 32  ;;  %p755_p3 = scmp.lt.s32.totalorder %s530_s14, %s530_s14 }
 0x475   :  { %p751_p2 = scmp.ne.s32.totalorder %s530_s14, %s750_s15  ;;  %p756_p4 = scmp.lt.s32.totalorder %s750_s15, %s750_s15 }
 0x477   :  { %p757_p5 = por %p756_p4, %p755_p3 }
 0x479   :  { %p758_p6 = pnand %p757_p5, %p751_p2 }
 0x52f   :  { %v498_v39 = vpop.f32.mrf.mxu0 }
 0x530   :  { %v499_v41 = vadd.f32 %v498_v39, %v423_v37 }
 0x531   :  { %v606_v42 = vpop.f32.mrf.mxu0 }
 0x532   :  { %v509_v43 = vadd.f32 %v558_v40, %v499_v41 }
 0x534   :  { %628 = vtanh.f32 %v509_v43 }
 0x541   :  { %v629_v44 = vpop.eup %628 }
 0x542   :  { %511 = vst.msk [vmem:[#allocation11] sm:$0x3] %vm185_vm2, %v629_v44 }
 0x543   :  { %761 = shalt.err (!%p758_p6)
}
 0x544   :  { %532 = dma.vmem_to_hbm [thread:$0]  %s530_s14, 32, %s946_s7, [#allocation4]  }
 0x545   :  { %776 = dma.done.wait [#allocation4], 32  }
 0x546   :  { %777 = vsyncadd [#allocation4], 4294967264 }
 0x547   :  { %778 = dma.done.wait [#allocation13], 32  }
 0x548   :  { %779 = vsyncadd [#allocation13], 4294967264 }
 0x549   :  { %549 = vsyncpa [#allocation3], 1 }
 0x54a   :  { %550 = vsyncpa [#allocation6], 1 }
 0x54b   :  { %551 = vsyncpa [#allocation9], 1 }
 0x54c   :  { %552 = vsyncpa [#allocation4], 1 }
 0x54d   :  { %553 = vsyncpa [#allocation13], 1 }

</bundles_post_ra>
